<compile_context>
chip_gen: v5e
topology: v5e:2x2
jax: 0.10.0
libtpu: 0.0.40
codegen_flags: <defaults>
</compile_context>

<pallas_src>
import jax
import jax.numpy as jnp
import numpy as np
from jax.experimental import pallas as pl
from jax.experimental.pallas import tpu as pltpu

_LANES = 128
_TARGET_BLOCK_BYTES = 4 * 1024 * 1024  # ~4 MiB per block (double-buffered in+out)
_LANE_WIDTH_CANDIDATES = (8192, 4096, 2048, 1024, 512, 256, 128)


def _copy_kernel(x_ref, o_ref):
    # The reference forward has no hot path (it is `pass`); the only faithful
    # in-kernel "compute" is a pass-through copy of the current lane-dense tile.
    o_ref[...] = x_ref[...]


def _pick_slab_shape(n_flat):
    """Factor the flat length into a lane-dense (rows, width) slab.

    Prefers a width whose row count is sublane-aligned (multiple of 8) so the
    block shape is (8,128)-friendly; n_flat is always a multiple of 128 here.
    """
    for w in _LANE_WIDTH_CANDIDATES:
        if n_flat % w == 0 and (n_flat // w) % 8 == 0:
            return n_flat // w, w
    for w in _LANE_WIDTH_CANDIDATES:
        if n_flat % w == 0:
            return n_flat // w, w
    # Unreachable: n_flat is padded to a multiple of 128.
    return n_flat // _LANES, _LANES


def _pallas_identity(x):
    """Lane-dense whole-array identity copy through VMEM.

    Debug / data-path-exercise only; intentionally NOT called from the
    production forward (the reference forward is a stub).
    """
    orig_shape = x.shape
    n = x.size

    flat = x.reshape(-1)
    pad = (-n) % _LANES
    if pad:
        # TODO(synk): non-128-aligned tail; wrapper pad + slice costs extra HBM
        # round-trips — a masked in-kernel tail store would avoid it.  Not hit
        # for the (lane-aligned) example shapes.
        flat = jnp.pad(flat, (0, pad))
    n_flat = flat.size

    rows, width = _pick_slab_shape(n_flat)
    slab = flat.reshape(rows, width)
    itemsize = slab.dtype.itemsize

    # ~4 MiB row tiles: big enough to amortize per-step overhead and sit on the
    # HBM roofline; anything larger than one block gets >=2 grid steps, which
    # lets the "parallel" grid axis shard across v7x's two TensorCores.
    tile_rows = max(_TARGET_BLOCK_BYTES // (width * itemsize), 8)
    tile_rows -= tile_rows % 8
    if tile_rows >= rows:
        tile_rows = rows  # single block equals full dims -> no (8,·) constraint
    grid_steps = pl.cdiv(rows, tile_rows)

    block_bytes = tile_rows * width * itemsize
    # 2 pipeline buffers x (input + output) per block, plus headroom; explicit
    # so v5e's 16 MiB default scoped limit never silently rejects the tiling,
    # and well under v7x's 64 MiB physical VMEM.
    vmem_limit = int(max(4 * block_bytes + (4 << 20), 16 << 20))

    out = pl.pallas_call(
        _copy_kernel,
        out_shape=jax.ShapeDtypeStruct((rows, width), slab.dtype),
        grid_spec=pltpu.PrefetchScalarGridSpec(
            num_scalar_prefetch=0,
            grid=(grid_steps,),
            in_specs=[pl.BlockSpec((tile_rows, width), lambda i: (i, 0))],
            out_specs=pl.BlockSpec((tile_rows, width), lambda i: (i, 0)),
        ),
        cost_estimate=pl.CostEstimate(
            flops=0,
            transcendentals=0,
            bytes_accessed=2 * n_flat * itemsize,
        ),
        compiler_params=pltpu.CompilerParams(
            dimension_semantics=("parallel",),
            vmem_limit_bytes=vmem_limit,
        ),
    )(slab)

    out = out.reshape(-1)
    if pad:
        out = out[:n]
    return out.reshape(orig_shape)


def pair_attentive_rnn_forward(x, *, debug_exercise_kernel=False):
    """Forward pass of PairAttentiveRNN.

    The PyTorch module's forward body is `pass`, so it returns None.  The
    identity kernel is dead work with respect to the module semantics, so it is
    kept OFF the production path (no HBM round-trip, no host sync) and can only
    be exercised explicitly via `debug_exercise_kernel=True`.
    """
    # TODO(synk): reference forward is an empty stub (`pass`); no attention /
    # RNN math exists to translate, so only the (debug-only) data-movement path
    # is kernelized.
    if debug_exercise_kernel:
        _ = _pallas_identity(x)  # no host sync here; caller blocks if needed
    return None


if __name__ == "__main__":
    key = jax.random.PRNGKey(0)
    # Small shapes consistent with a generic NCHW module input.
    x = jax.random.normal(key, (2, 4, 16, 16), dtype=jnp.float32)
    x_host = np.asarray(x)

    # Exercise the underlying kernel once and block on its result.
    y = _pallas_identity(x)
    jax.block_until_ready(y)

    # Sanity: identity kernel must reproduce the input bit-exactly.
    assert np.array_equal(np.asarray(y), x_host), "identity kernel mismatch"

    # Module-level forward semantics: returns None, does no kernel work.
    out = pair_attentive_rnn_forward(x)
    assert out is None

    print("KERNEL_OK")
</pallas_src>

<mosaic_0001>
module attributes {stable_mosaic.version = 11 : i64} {
  func.func @_copy_kernel(%arg0: i32, %arg1: memref<8x256xf32, #tpu.memory_space<vmem>>, %arg2: memref<8x256xf32, #tpu.memory_space<vmem>>) attributes {dimension_semantics = [#tpu.dimension_semantics<parallel>], iteration_bounds = array<i64: 1>, scalar_prefetch = 0 : i64, scratch_operands = 0 : i64, tpu.core_type = #tpu.core_type<tc>, window_params = [{transform_indices = @transform_0, window_bounds = array<i64: 8, 256>}, {transform_indices = @transform_1, window_bounds = array<i64: 8, 256>}]} {
    %c0 = arith.constant 0 : index
    %c0_0 = arith.constant 0 : index
    %0 = vector.load %arg1[%c0, %c0_0] : memref<8x256xf32, #tpu.memory_space<vmem>>, vector<8x256xf32>
    %c0_1 = arith.constant 0 : index
    %c0_2 = arith.constant 0 : index
    %1 = vector.load %arg2[%c0_1, %c0_2] : memref<8x256xf32, #tpu.memory_space<vmem>>, vector<8x256xf32>
    tpu.vector_store %arg2[%c0_1, %c0_2], %0 {strides = array<i32>} : memref<8x256xf32, #tpu.memory_space<vmem>>, vector<8x256xf32>,
    return
  }
  func.func @transform_0(%arg0: i32) -> (i32, i32) {
    %c0_i32 = arith.constant 0 : i32
    %c0_i32_0 = arith.constant 0 : i32
    return %arg0, %c0_i32 : i32, i32
  }
  func.func @transform_1(%arg0: i32) -> (i32, i32) {
    %c0_i32 = arith.constant 0 : i32
    %c0_i32_0 = arith.constant 0 : i32
    return %arg0, %c0_i32 : i32, i32
  }
}

</mosaic_0001>

<bundles_post_ra>
// kernel: tpu_custom_call.1
= control target key start
LH: loop header
LB: loop body
LE: loop exit
PB: predicated region body
PF: predicated region fallthrough
CT: control target
= control target key end

     0   :  { %6 = vsyncpa [#allocation3], 0  ;;  %s116_s0 = inlined_call_operand.hbm [shape: f32[8,256], index: 0, kind: input, shape index: {}]   ;;  %s117_s1 = inlined_call_operand.hbm [shape: f32[8,256], index: 1, kind: output, shape index: {}]  }
   0x1   :  { %7 = vsyncpa [#allocation4], 0  ;;  %s13_s8 = sshll.u32 %s116_s0, 4  ;;  %s98_s9 = smov [#allocation2]   ;;  %s14_s8 = int_to_ptr.hbm [resolvable:$true] %s13_s8 }
   0x2   :  { %s15_s10 = sshll.u32 %s98_s9, 4  ;;  %s16_s10 = int_to_ptr.vmem [resolvable:$true] %s15_s10 }
   0x3   :  { %18 = dma.hbm_to_vmem [thread:$0]  %s14_s8, 256, %s16_s10, [#allocation3]  }
   0x4   :  { %94 = dma.done.wait [#allocation3], 256  }
   0x5   :  { %95 = vsyncadd [#allocation3], 4294967040  ;;  %s99_s11 = smov [#allocation5]   ;;  %s34_s15 = sshll.u32 %s117_s1, 4  ;;  %v23_v0 = vld [vmem:[#allocation2] sm:$0xff]  ;;  %v24_v1 = vld [vmem:[#allocation2 + $0x8] sm:$0xff]  ;;  %s35_s15 = int_to_ptr.hbm [resolvable:$true] %s34_s15 }
   0x6   :  { %s32_s12 = sshll.u32 %s99_s11, 4  ;;  %25 = vst [vmem:[#allocation5] sm:$0xff] %v23_v0  ;;  %s33_s12 = int_to_ptr.vmem [resolvable:$true] %s32_s12 }
   0x7   :  { %26 = vst [vmem:[#allocation5 + $0x8] sm:$0xff] %v24_v1 }
   0x8   :  { %37 = dma.vmem_to_hbm [thread:$0]  %s33_s12, 256, %s35_s15, [#allocation4]  }
   0x9   :  { %96 = dma.done.wait [#allocation4], 256  }
   0xa   :  { %97 = vsyncadd [#allocation4], 4294967040 }
   0xb   :  { %42 = vsyncpa [#allocation3], 1 }
   0xc   :  { %43 = vsyncpa [#allocation4], 1 }

</bundles_post_ra>
